<compile_context>
chip_gen: v7x
topology: tpu7x:2x2x1
jax: 0.10.0
libtpu: 0.0.40
codegen_flags: <defaults>
</compile_context>

<pallas_src>
import jax
import jax.numpy as jnp
from jax import lax
from jax.experimental import pallas as pl
from jax.experimental.pallas import tpu as pltpu

f32 = jnp.float32
bf16 = jnp.bfloat16


def _round_up(v, m):
    return (v + m - 1) // m * m


def _pad_to(a, shape):
    pads = [(0, s - d) for d, s in zip(a.shape, shape)]
    return jnp.pad(a, pads)


def _vmem_capacity_bytes():
    try:
        return int(pltpu.get_tpu_info().vmem_capacity_bytes)
    except Exception:
        return 64 << 20  # conservative fallback: v7x per-TensorCore physical VMEM


def glore_unit(x, params, *, block_l=1024):
    """x: (N, C, H, W); params: dict from make_params. Returns (N, C, H, W), x.dtype."""
    N, C, H, W = x.shape
    L = H * W
    out_dtype = x.dtype
    x_isz = jnp.dtype(x.dtype).itemsize
    out_isz = jnp.dtype(out_dtype).itemsize
    num_s = params["w_state"].shape[0]
    num_n = params["w_proj"].shape[0]

    # Padded graph-space sizes: num_n sits on the lane axis of a/h/h2/M -> 128 multiple;
    # num_s only needs sublane alignment.
    S_pad = _round_up(num_s, 16)
    Nn_pad = _round_up(num_n, 128)

    # --- L tiling: pad L only to the 128-lane boundary and require tL | L_pad so no
    #     extra dead columns are DMA'd / matmul'd in either pass. -----------------------
    L_pad = _round_up(L, 128)
    target_tl = _round_up(min(max(block_l, 128), L_pad), 128)

    cap = _vmem_capacity_bytes()
    budget = int(cap * 0.60)  # headroom for compiler-internal scratch / pipelining

    def _vmem_needed(tl):
        # double-buffered blocks (x2) per input/output + resident f32 accumulator
        w_bytes = ((S_pad + Nn_pad) * C * 2 + (S_pad + Nn_pad) * 4     # fused W (bf16) + b
                   + Nn_pad * Nn_pad * 4 + Nn_pad * 4                  # W1^T + b1
                   + S_pad * S_pad * 4 + C * S_pad * 2                 # W2 + We (bf16)
                   + S_pad * Nn_pad * 4)                               # a_init
        pass_a = 2 * (C * tl * x_isz + C * Nn_pad * 2 + w_bytes) + S_pad * Nn_pad * 4
        pass_b = 2 * (C * tl * x_isz + C * tl * out_isz + C * Nn_pad * 2
                      + Nn_pad * C * 2 + Nn_pad * 4)
        return max(pass_a, pass_b)

    tL = 128
    for k in range(1, L_pad // 128 + 1):
        cand = 128 * k
        if L_pad % cand != 0 or cand > target_tl:
            continue
        if _vmem_needed(cand) <= budget:
            tL = cand
    LT = L_pad // tL
    vmem_limit = int(min(cap * 0.85, max(2 * _vmem_needed(tL), 16 << 20)))

    # --- pack / pad / cast weights once on the host ------------------------------------
    w_state = _pad_to(params["w_state"].astype(f32), (S_pad, C))
    b_state = _pad_to(params["b_state"].astype(f32), (S_pad, 1))
    w_proj = _pad_to(params["w_proj"].astype(f32), (Nn_pad, C))
    b_proj = _pad_to(params["b_proj"].astype(f32), (Nn_pad, 1))
    w_sp = jnp.concatenate([w_state, w_proj], axis=0).astype(bf16)   # fused state+proj W
    b_sp = jnp.concatenate([b_state, b_proj], axis=0)                # f32 bias column
    w1t = _pad_to(params["w_gcn1"].astype(f32), (Nn_pad, Nn_pad)).T  # pre-transposed
    b1row = _pad_to(params["b_gcn1"].astype(f32), (Nn_pad, 1)).T     # (1, Nn_pad)
    w2 = _pad_to(params["w_gcn2"].astype(f32), (S_pad, S_pad))
    we_bf = _pad_to(params["w_extend"].astype(f32), (C, S_pad)).astype(bf16)
    wp_bf = w_proj.astype(bf16)

    # Rank-1 correction for the bias leak from the (L_pad - L) zero-padded spatial
    # columns (replaces per-tile masking): each padded column contributes
    # bf16(b_state) (x) bf16(b_proj) to `a`, so start the accumulator at minus that.
    bs_bf = b_state.astype(bf16).astype(f32)
    bp_bf = b_proj.astype(bf16).astype(f32)
    a_init = (-float(L_pad - L)) * (bs_bf @ bp_bf.T)                 # (S_pad, Nn_pad) f32

    x_flat = x.reshape(N, C, L)
    if L_pad != L:
        x_flat = jnp.pad(x_flat, ((0, 0), (0, 0), (0, L_pad - L)))

    # --- pass A: a = sum_L x_state @ x_proj^T, then the tiny GCN + conv_extend ---------
    def reduce_kernel(x_ref, wsp_ref, bsp_ref, ainit_ref, w1t_ref, b1_ref, w2_ref,
                      we_ref, m_ref, a_acc):
        t = pl.program_id(1)

        @pl.when(t == 0)
        def _init():
            a_acc[...] = ainit_ref[...]

        x_t = x_ref[...].astype(bf16)                                      # (C, tL)
        y = jnp.dot(wsp_ref[...], x_t, preferred_element_type=f32) + bsp_ref[...]
        xs = y[:S_pad].astype(bf16)                                        # (S_pad, tL)
        xp = y[S_pad:].astype(bf16)                                        # (Nn_pad, tL)
        # a += xs @ xp^T as an NT dot_general: no materialized transpose, bf16 MXU pass.
        a_acc[...] += lax.dot_general(xs, xp, (((1,), (1,)), ((), ())),
                                      preferred_element_type=f32)          # (S_pad, Nn_pad)

        @pl.when(t == pl.num_programs(1) - 1)
        def _finalize():
            a = a_acc[...]
            # GCN: conv1 over node dim (a @ W1^T + b1), residual, ReLU, conv2 over state dim
            h = jnp.dot(a, w1t_ref[...], preferred_element_type=f32) + b1_ref[...]
            h = jnp.maximum(h + a, 0.0)
            h2 = jnp.dot(w2_ref[...], h, preferred_element_type=f32)
            # fold conv_extend in:  M = W_extend @ h2   (C, Nn_pad), bf16 MXU
            m = jnp.dot(we_ref[...], h2.astype(bf16), preferred_element_type=f32)
            m_ref[...] = m.astype(m_ref.dtype)

    gcn_flops = (2 * S_pad * Nn_pad * Nn_pad + 2 * S_pad * S_pad * Nn_pad
                 + 2 * C * S_pad * Nn_pad)
    flops_a = N * (2 * L_pad * C * (S_pad + Nn_pad) + 2 * L_pad * S_pad * Nn_pad
                   + gcn_flops)
    bytes_a = (N * C * L_pad * x_isz + N * C * Nn_pad * 2
               + (S_pad + Nn_pad) * C * 2 + (S_pad + Nn_pad) * 4
               + S_pad * Nn_pad * 4 + Nn_pad * Nn_pad * 4 + Nn_pad * 4
               + S_pad * S_pad * 4 + C * S_pad * 2)
    cost_a = pl.CostEstimate(flops=flops_a, transcendentals=0, bytes_accessed=bytes_a)

    m_out = pl.pallas_call(
        reduce_kernel,
        out_shape=jax.ShapeDtypeStruct((N, C, Nn_pad), bf16),
        grid_spec=pltpu.PrefetchScalarGridSpec(
            num_scalar_prefetch=0,
            grid=(N, LT),
            in_specs=[
                pl.BlockSpec((pl.Squeezed(), C, tL), lambda n, t: (n, 0, t)),   # x
                pl.BlockSpec((S_pad + Nn_pad, C), lambda n, t: (0, 0)),         # fused W
                pl.BlockSpec((S_pad + Nn_pad, 1), lambda n, t: (0, 0)),         # fused b
                pl.BlockSpec((S_pad, Nn_pad), lambda n, t: (0, 0)),             # a_init
                pl.BlockSpec((Nn_pad, Nn_pad), lambda n, t: (0, 0)),            # W1^T
                pl.BlockSpec((1, Nn_pad), lambda n, t: (0, 0)),                 # b1 row
                pl.BlockSpec((S_pad, S_pad), lambda n, t: (0, 0)),              # W2
                pl.BlockSpec((C, S_pad), lambda n, t: (0, 0)),                  # W_extend
            ],
            out_specs=pl.BlockSpec((pl.Squeezed(), C, Nn_pad), lambda n, t: (n, 0, 0)),
            scratch_shapes=[pltpu.VMEM((S_pad, Nn_pad), f32)],
        ),
        compiler_params=pltpu.CompilerParams(
            dimension_semantics=("parallel", "arbitrary"),
            vmem_limit_bytes=vmem_limit),
        cost_estimate=cost_a,
    )(x_flat, w_sp, b_sp, a_init, w1t, b1row, w2, we_bf)

    # --- pass B: per-tile reverse projection + full-precision residual -----------------
    def project_kernel(x_ref, m_ref, wp_ref, bp_ref, out_ref):
        x_t = x_ref[...]                                                    # (C, tL) orig dtype
        xb = x_t.astype(bf16)
        xp = jnp.dot(wp_ref[...], xb, preferred_element_type=f32) + bp_ref[...]
        xp = xp.astype(bf16)                                                # (Nn_pad, tL)
        y = jnp.dot(m_ref[...], xp, preferred_element_type=f32)            # (C, tL) f32
        out_ref[...] = (x_t.astype(f32) + y).astype(out_ref.dtype)

    flops_b = N * (2 * Nn_pad * C * L_pad + 2 * C * Nn_pad * L_pad)
    bytes_b = (N * C * L_pad * (x_isz + out_isz) + N * C * Nn_pad * 2
               + Nn_pad * (C * 2 + 4))
    cost_b = pl.CostEstimate(flops=flops_b, transcendentals=0, bytes_accessed=bytes_b)

    out_flat = pl.pallas_call(
        project_kernel,
        out_shape=jax.ShapeDtypeStruct((N, C, L_pad), out_dtype),
        grid_spec=pltpu.PrefetchScalarGridSpec(
            num_scalar_prefetch=0,
            grid=(N, LT),
            in_specs=[
                pl.BlockSpec((pl.Squeezed(), C, tL), lambda n, t: (n, 0, t)),     # x
                pl.BlockSpec((pl.Squeezed(), C, Nn_pad), lambda n, t: (n, 0, 0)), # M
                pl.BlockSpec((Nn_pad, C), lambda n, t: (0, 0)),                   # W_proj
                pl.BlockSpec((Nn_pad, 1), lambda n, t: (0, 0)),                   # b_proj
            ],
            out_specs=pl.BlockSpec((pl.Squeezed(), C, tL), lambda n, t: (n, 0, t)),
        ),
        compiler_params=pltpu.CompilerParams(
            dimension_semantics=("parallel", "parallel"),
            vmem_limit_bytes=vmem_limit),
        cost_estimate=cost_b,
    )(x_flat, m_out, wp_bf, b_proj)

    if L_pad != L:
        out_flat = out_flat[:, :, :L]
    return out_flat.reshape(N, C, H, W)


def glore_unit_ref(x, params):
    """Pure-JAX reference mirroring the kernel's bf16-matmul / f32-accumulation policy."""
    N, C, H, W = x.shape
    L = H * W
    xf = x.reshape(N, C, L)
    xb = xf.astype(bf16)
    xs = jnp.einsum("sc,ncl->nsl", params["w_state"].astype(bf16), xb,
                    preferred_element_type=f32) + params["b_state"][None]
    xp = jnp.einsum("mc,ncl->nml", params["w_proj"].astype(bf16), xb,
                    preferred_element_type=f32) + params["b_proj"][None]
    a = jnp.einsum("nsl,nml->nsm", xs.astype(bf16), xp.astype(bf16),
                   preferred_element_type=f32)
    h = jnp.einsum("nsm,km->nsk", a, params["w_gcn1"],
                   preferred_element_type=f32) + params["b_gcn1"][:, 0][None, None, :]
    h = jax.nn.relu(h + a)
    h2 = jnp.einsum("ts,nsm->ntm", params["w_gcn2"], h, preferred_element_type=f32)
    m = jnp.einsum("cs,nsm->ncm", params["w_extend"].astype(bf16), h2.astype(bf16),
                   preferred_element_type=f32).astype(bf16)
    out = xf.astype(f32) + jnp.einsum("ncm,nml->ncl", m, xp.astype(bf16),
                                      preferred_element_type=f32)
    return out.reshape(N, C, H, W).astype(x.dtype)


def make_params(key, num_in, num_mid):
    num_s, num_n = 2 * num_mid, num_mid
    ks = jax.random.split(key, 7)
    scale = 0.1
    return {
        "w_state": scale * jax.random.normal(ks[0], (num_s, num_in), jnp.float32),
        "b_state": scale * jax.random.normal(ks[1], (num_s, 1), jnp.float32),
        "w_proj": scale * jax.random.normal(ks[2], (num_n, num_in), jnp.float32),
        "b_proj": scale * jax.random.normal(ks[3], (num_n, 1), jnp.float32),
        "w_gcn1": scale * jax.random.normal(ks[4], (num_n, num_n), jnp.float32),
        "b_gcn1": scale * jax.random.normal(ks[5], (num_n, 1), jnp.float32),
        "w_gcn2": scale * jax.random.normal(ks[6], (num_s, num_s), jnp.float32),
        "w_extend": scale * jax.random.normal(jax.random.fold_in(key, 99),
                                              (num_in, num_s), jnp.float32),
    }


if __name__ == "__main__":
    key = jax.random.PRNGKey(0)
    # num_s=8, num_n=4, L=240 -> L_pad=256 exercises both the multi-step accumulation
    # (2 L tiles at block_l=128) and the rank-1 padded-column bias correction.
    N, num_in, num_mid, H, W = 2, 4, 4, 16, 15
    kx, kp = jax.random.split(key)
    x = jax.random.normal(kx, (N, num_in, H, W), jnp.float32)
    params = make_params(kp, num_in, num_mid)

    out = jax.block_until_ready(glore_unit(x, params, block_l=128))
    ref = jax.block_until_ready(glore_unit_ref(x, params))

    assert out.shape == x.shape
    max_err = float(jnp.max(jnp.abs(out - ref)))
    assert jnp.allclose(out, ref, atol=2e-2, rtol=2e-2), max_err
    print("KERNEL_OK")
</pallas_src>

<mosaic_0001>
module attributes {stable_mosaic.version = 11 : i64} {
  func.func @reduce_kernel(%arg0: i32, %arg1: i32, %arg2: memref<1x4x128xf32, #tpu.memory_space<vmem>>, %arg3: memref<144x4xbf16, #tpu.memory_space<vmem>>, %arg4: memref<144x1xf32, #tpu.memory_space<vmem>>, %arg5: memref<16x128xf32, #tpu.memory_space<vmem>>, %arg6: memref<128x128xf32, #tpu.memory_space<vmem>>, %arg7: memref<1x128xf32, #tpu.memory_space<vmem>>, %arg8: memref<16x16xf32, #tpu.memory_space<vmem>>, %arg9: memref<4x16xbf16, #tpu.memory_space<vmem>>, %arg10: memref<1x4x128xbf16, #tpu.memory_space<vmem>>, %arg11: memref<16x128xf32, #tpu.memory_space<vmem>>) attributes {dimension_semantics = [#tpu.dimension_semantics<parallel>, #tpu.dimension_semantics<arbitrary>], iteration_bounds = array<i64: 2, 2>, scalar_prefetch = 0 : i64, scratch_operands = 1 : i64, tpu.core_type = #tpu.core_type<tc>, window_params = [{transform_indices = @transform_0, window_bounds = array<i64: 1, 4, 128>}, {pipeline_mode = #tpu.pipeline_mode<synchronous>, transform_indices = @transform_1, window_bounds = array<i64: 144, 4>}, {pipeline_mode = #tpu.pipeline_mode<synchronous>, transform_indices = @transform_2, window_bounds = array<i64: 144, 1>}, {pipeline_mode = #tpu.pipeline_mode<synchronous>, transform_indices = @transform_3, window_bounds = array<i64: 16, 128>}, {pipeline_mode = #tpu.pipeline_mode<synchronous>, transform_indices = @transform_4, window_bounds = array<i64: 128, 128>}, {pipeline_mode = #tpu.pipeline_mode<synchronous>, transform_indices = @transform_5, window_bounds = array<i64: 1, 128>}, {pipeline_mode = #tpu.pipeline_mode<synchronous>, transform_indices = @transform_6, window_bounds = array<i64: 16, 16>}, {pipeline_mode = #tpu.pipeline_mode<synchronous>, transform_indices = @transform_7, window_bounds = array<i64: 4, 16>}, {transform_indices = @transform_8, window_bounds = array<i64: 1, 4, 128>}]} {
    %c0_i32 = arith.constant 0 : i32
    %0 = arith.cmpi eq, %arg1, %c0_i32 : i32
    %1 = arith.extui %0 : i1 to i32
    %c0_i32_0 = arith.constant 0 : i32
    %2 = arith.cmpi ne, %1, %c0_i32_0 : i32
    scf.if %2 {
      %c0_13 = arith.constant 0 : index
      %c0_14 = arith.constant 0 : index
      %22 = vector.load %arg5[%c0_13, %c0_14] : memref<16x128xf32, #tpu.memory_space<vmem>>, vector<16x128xf32>
      %c0_15 = arith.constant 0 : index
      %c0_16 = arith.constant 0 : index
      %23 = vector.load %arg11[%c0_15, %c0_16] : memref<16x128xf32, #tpu.memory_space<vmem>>, vector<16x128xf32>
      tpu.vector_store %arg11[%c0_15, %c0_16], %22 {strides = array<i32>} : memref<16x128xf32, #tpu.memory_space<vmem>>, vector<16x128xf32>,
    } else {
    }
    %c0 = arith.constant 0 : index
    %c0_1 = arith.constant 0 : index
    %c0_2 = arith.constant 0 : index
    %3 = vector.load %arg2[%c0, %c0_1, %c0_2] : memref<1x4x128xf32, #tpu.memory_space<vmem>>, vector<1x4x128xf32>
    %4 = vector.shape_cast %3 : vector<1x4x128xf32> to vector<4x128xf32>
    %5 = arith.truncf %4 : vector<4x128xf32> to vector<4x128xbf16>
    %c0_3 = arith.constant 0 : index
    %c0_4 = arith.constant 0 : index
    %6 = vector.load %arg3[%c0_3, %c0_4] : memref<144x4xbf16, #tpu.memory_space<vmem>>, vector<144x4xbf16>
    %cst = arith.constant dense<0.000000e+00> : vector<144x128xf32>
    %7 = tpu.matmul %6, %5, %cst {dimension_numbers = #tpu.dot_dimension_numbers<[1], [0], [0], [1], [0, 0, 1, 1], [], []>} : vector<144x4xbf16>, vector<4x128xbf16>, vector<144x128xf32> -> vector<144x128xf32>
    %c0_5 = arith.constant 0 : index
    %c0_6 = arith.constant 0 : index
    %8 = vector.load %arg4[%c0_5, %c0_6] : memref<144x1xf32, #tpu.memory_space<vmem>>, vector<144x1xf32>
    %9 = vector.broadcast %8 : vector<144x1xf32> to vector<144x128xf32>
    %10 = arith.addf %7, %9 : vector<144x128xf32>
    %11 = vector.extract_strided_slice %10 {offsets = [0, 0], sizes = [16, 128], strides = [1, 1]} : vector<144x128xf32> to vector<16x128xf32>
    %12 = arith.truncf %11 : vector<16x128xf32> to vector<16x128xbf16>
    %13 = vector.extract_strided_slice %10 {offsets = [16, 0], sizes = [128, 128], strides = [1, 1]} : vector<144x128xf32> to vector<128x128xf32>
    %14 = arith.truncf %13 : vector<128x128xf32> to vector<128x128xbf16>
    %c0_7 = arith.constant 0 : index
    %c0_8 = arith.constant 0 : index
    %15 = vector.load %arg11[%c0_7, %c0_8] : memref<16x128xf32, #tpu.memory_space<vmem>>, vector<16x128xf32>
    %cst_9 = arith.constant dense<0.000000e+00> : vector<16x128xf32>
    %16 = tpu.matmul %12, %14, %cst_9 {dimension_numbers = #tpu.dot_dimension_numbers<[1], [1], [0], [0], [0, 0, 1, 0], [], []>} : vector<16x128xbf16>, vector<128x128xbf16>, vector<16x128xf32> -> vector<16x128xf32>
    %17 = arith.addf %15, %16 : vector<16x128xf32>
    %c0_10 = arith.constant 0 : index
    %c0_11 = arith.constant 0 : index
    %18 = vector.load %arg11[%c0_10, %c0_11] : memref<16x128xf32, #tpu.memory_space<vmem>>, vector<16x128xf32>
    tpu.vector_store %arg11[%c0_10, %c0_11], %17 {strides = array<i32>} : memref<16x128xf32, #tpu.memory_space<vmem>>, vector<16x128xf32>,
    %c1_i32 = arith.constant 1 : i32
    %19 = arith.cmpi eq, %arg1, %c1_i32 : i32
    %20 = arith.extui %19 : i1 to i32
    %c0_i32_12 = arith.constant 0 : i32
    %21 = arith.cmpi ne, %20, %c0_i32_12 : i32
    scf.if %21 {
      %c0_13 = arith.constant 0 : index
      %c0_14 = arith.constant 0 : index
      %22 = vector.load %arg11[%c0_13, %c0_14] : memref<16x128xf32, #tpu.memory_space<vmem>>, vector<16x128xf32>
      %c0_15 = arith.constant 0 : index
      %c0_16 = arith.constant 0 : index
      %23 = vector.load %arg6[%c0_15, %c0_16] : memref<128x128xf32, #tpu.memory_space<vmem>>, vector<128x128xf32>
      %cst_17 = arith.constant dense<0.000000e+00> : vector<16x128xf32>
      %24 = tpu.matmul %22, %23, %cst_17 {dimension_numbers = #tpu.dot_dimension_numbers<[1], [0], [0], [1], [0, 0, 1, 1], [], []>} : vector<16x128xf32>, vector<128x128xf32>, vector<16x128xf32> -> vector<16x128xf32>
      %c0_18 = arith.constant 0 : index
      %c0_19 = arith.constant 0 : index
      %25 = vector.load %arg7[%c0_18, %c0_19] : memref<1x128xf32, #tpu.memory_space<vmem>>, vector<1x128xf32>
      %26 = vector.broadcast %25 : vector<1x128xf32> to vector<16x128xf32>
      %27 = arith.addf %24, %26 : vector<16x128xf32>
      %28 = arith.addf %27, %22 : vector<16x128xf32>
      %cst_20 = arith.constant 0.000000e+00 : f32
      %29 = vector.broadcast %cst_20 : f32 to vector<16x128xf32>
      %30 = arith.maximumf %28, %29 : vector<16x128xf32>
      %c0_21 = arith.constant 0 : index
      %c0_22 = arith.constant 0 : index
      %31 = vector.load %arg8[%c0_21, %c0_22] : memref<16x16xf32, #tpu.memory_space<vmem>>, vector<16x16xf32>
      %cst_23 = arith.constant dense<0.000000e+00> : vector<16x128xf32>
      %32 = tpu.matmul %31, %30, %cst_23 {dimension_numbers = #tpu.dot_dimension_numbers<[1], [0], [0], [1], [0, 0, 1, 1], [], []>} : vector<16x16xf32>, vector<16x128xf32>, vector<16x128xf32> -> vector<16x128xf32>
      %c0_24 = arith.constant 0 : index
      %c0_25 = arith.constant 0 : index
      %33 = vector.load %arg9[%c0_24, %c0_25] : memref<4x16xbf16, #tpu.memory_space<vmem>>, vector<4x16xbf16>
      %34 = arith.truncf %32 : vector<16x128xf32> to vector<16x128xbf16>
      %cst_26 = arith.constant dense<0.000000e+00> : vector<4x128xf32>
      %35 = tpu.matmul %33, %34, %cst_26 {dimension_numbers = #tpu.dot_dimension_numbers<[1], [0], [0], [1], [0, 0, 1, 1], [], []>} : vector<4x16xbf16>, vector<16x128xbf16>, vector<4x128xf32> -> vector<4x128xf32>
      %36 = arith.truncf %35 : vector<4x128xf32> to vector<4x128xbf16>
      %c0_27 = arith.constant 0 : index
      %c0_28 = arith.constant 0 : index
      %c0_29 = arith.constant 0 : index
      %37 = vector.load %arg10[%c0_27, %c0_28, %c0_29] : memref<1x4x128xbf16, #tpu.memory_space<vmem>>, vector<1x4x128xbf16>
      %38 = vector.shape_cast %37 : vector<1x4x128xbf16> to vector<4x128xbf16>
      %39 = vector.shape_cast %36 : vector<4x128xbf16> to vector<1x4x128xbf16>
      tpu.vector_store %arg10[%c0_27, %c0_28, %c0_29], %39 {strides = array<i32>} : memref<1x4x128xbf16, #tpu.memory_space<vmem>>, vector<1x4x128xbf16>,
    } else {
    }
    return
  }
  func.func @transform_0(%arg0: i32, %arg1: i32) -> (i32, i32, i32) {
    %c0_i32 = arith.constant 0 : i32
    %c0_i32_0 = arith.constant 0 : i32
    return %arg0, %c0_i32, %arg1 : i32, i32, i32
  }
  func.func @transform_1(%arg0: i32, %arg1: i32) -> (i32, i32) {
    %c0_i32 = arith.constant 0 : i32
    %c0_i32_0 = arith.constant 0 : i32
    %c0_i32_1 = arith.constant 0 : i32
    return %c0_i32, %c0_i32_0 : i32, i32
  }
  func.func @transform_2(%arg0: i32, %arg1: i32) -> (i32, i32) {
    %c0_i32 = arith.constant 0 : i32
    %c0_i32_0 = arith.constant 0 : i32
    %c0_i32_1 = arith.constant 0 : i32
    return %c0_i32, %c0_i32_0 : i32, i32
  }
  func.func @transform_3(%arg0: i32, %arg1: i32) -> (i32, i32) {
    %c0_i32 = arith.constant 0 : i32
    %c0_i32_0 = arith.constant 0 : i32
    %c0_i32_1 = arith.constant 0 : i32
    return %c0_i32, %c0_i32_0 : i32, i32
  }
  func.func @transform_4(%arg0: i32, %arg1: i32) -> (i32, i32) {
    %c0_i32 = arith.constant 0 : i32
    %c0_i32_0 = arith.constant 0 : i32
    %c0_i32_1 = arith.constant 0 : i32
    return %c0_i32, %c0_i32_0 : i32, i32
  }
  func.func @transform_5(%arg0: i32, %arg1: i32) -> (i32, i32) {
    %c0_i32 = arith.constant 0 : i32
    %c0_i32_0 = arith.constant 0 : i32
    %c0_i32_1 = arith.constant 0 : i32
    return %c0_i32, %c0_i32_0 : i32, i32
  }
  func.func @transform_6(%arg0: i32, %arg1: i32) -> (i32, i32) {
    %c0_i32 = arith.constant 0 : i32
    %c0_i32_0 = arith.constant 0 : i32
    %c0_i32_1 = arith.constant 0 : i32
    return %c0_i32, %c0_i32_0 : i32, i32
  }
  func.func @transform_7(%arg0: i32, %arg1: i32) -> (i32, i32) {
    %c0_i32 = arith.constant 0 : i32
    %c0_i32_0 = arith.constant 0 : i32
    %c0_i32_1 = arith.constant 0 : i32
    return %c0_i32, %c0_i32_0 : i32, i32
  }
  func.func @transform_8(%arg0: i32, %arg1: i32) -> (i32, i32, i32) {
    %c0_i32 = arith.constant 0 : i32
    %c0_i32_0 = arith.constant 0 : i32
    %c0_i32_1 = arith.constant 0 : i32
    return %arg0, %c0_i32, %c0_i32_0 : i32, i32, i32
  }
}

</mosaic_0001>

<bundles_post_ra>
// kernel: tpu_custom_call.1
= control target key start
LH: loop header
LB: loop body
LE: loop exit
PB: predicated region body
PF: predicated region fallthrough
CT: control target
= control target key end

     0   :  { %13 = vsyncpa [#allocation4], 0  ;;  %s1842_s0 = inlined_call_operand.vmem [shape: f32[2,4,256], index: 0, kind: input, shape index: {}]   ;;  %s1843_s1 = inlined_call_operand.vmem [shape: bf16[144,4], index: 1, kind: input, shape index: {}]   ;;  %s1844_s2 = inlined_call_operand.vmem [shape: f32[144,1], index: 2, kind: input, shape index: {}]   ;;  %s1845_s3 = inlined_call_operand.vmem [shape: f32[16,128], index: 3, kind: input, shape index: {}]   ;;  %s1846_s4 = inlined_call_operand.vmem [shape: f32[128,128], index: 4, kind: input, shape index: {}]   ;;  %s1847_s5 = inlined_call_operand.vmem [shape: f32[1,128], index: 5, kind: input, shape index: {}]   ;;  %s1848_s6 = inlined_call_operand.vmem [shape: f32[16,16], index: 6, kind: input, shape index: {}]   ;;  %s1849_s7 = inlined_call_operand.vmem [shape: bf16[4,16], index: 7, kind: input, shape index: {}]   ;;  %s1850_s8 = inlined_call_operand.hbm [shape: bf16[2,4,128], index: 8, kind: output, shape index: {}]  }
   0x1   :  { %15 = vsyncpa [#allocation4 + $0x1], 0  ;;  %s1486_s27 = smov 0   ;;  %s1488_s28 = smov 0  }
   0x2   :  { %s1490_s29 = smov 0   ;;  %s1492_s30 = smov 0  }
   0x3   :  { %s1494_s9 = smov 0   ;;  %s1496_s10 = smov 0  }
   0x4   :  { %s1498_s11 = smov 0   ;;  %s1500_s12 = smov 0  }
   0x5 LB: > { %1855 = sst [smem:[#allocation6_spill]] %s1425_s10  ;;  %s1031_s13 = sadd.s32 4294967295, %s1433_s12   ;;  %s1433_s12 = sphi %s1500_s12, %s21_s12   ;;  %s1429_s11 = sphi %s1498_s11, %s1867_s11   ;;  %s1425_s10 = sphi %s1496_s10, %s1871_s10   ;;  %s1421_s9 = sphi %s1494_s9, %s1865_s9   ;;  %s1417_s30 = sphi %s1492_s30, %s1864_s30   ;;  %s1413_s29 = sphi %s1490_s29, %s1870_s29   ;;  %s1409_s28 = sphi %s1488_s28, %s1869_s28   ;;  %s1405_s27 = sphi %s1486_s27, %s1868_s27  }
   0x6   : > { %1856 = sst [smem:[#allocation7_spill]] %s1429_s11  ;;  %s1032_s14 = sadd.s32 4294967294, %s1433_s12  }
   0x7   : > { %s30_s15 = sadd.s32 1, %s1425_s10  ;;  %s33_s16 = sadd.s32 1, %s1429_s11 }
   0x8   : > { %p31_p0 = scmp.ge.s32.totalorder %s30_s15, 2  ;;  %p225_p1 = scmp.ne.s32.totalorder %s1413_s29, %s1409_s28 }
   0x9   : > { %p226_p2 = scmp.eq.s32.totalorder %s1031_s13, 3  ;;  %p231_p4 = scmp.ne.s32.totalorder %s1409_s28, %s1405_s27 }
   0xa   : > { %s1873_s15 = smov (%p31_p0, %s30_s15), 0  ;;  %s1875_s16 = smov (!%p31_p0, %s33_s16), %s1429_s11 }
   0xb   : > { %1857 = sst [smem:[#allocation8_spill]] %s1873_s15  ;;  %p1535_p3 = por %p226_p2, %p225_p1 }
   0xc   : > { %p35_p5 = scmp.ge.s32.totalorder %s1875_s16, 2  ;;  %p232_p6 = scmp.eq.s32.totalorder %s1032_s14, 3 }
   0xd   : > { %p1035_p7 = scmp.ge.s32.totalorder %s1433_s12, 1  ;;  %p282_p8 = scmp.lt.s32.totalorder %s1433_s12, 5 }
   0xe   : > { %s1877_s16 = smov (%p35_p5, %s1875_s16), 0  ;;  %p1545_p9 = por %p232_p6, %p231_p4 }
   0xf   : > { %1859 = sst [smem:[#allocation9_spill]] %s1877_s16  ;;  %p283_p10 = pnand %p1035_p7, %p282_p8 }
  0x10   : > { %s212_s19 = ssub.s32 %s1429_s11, %s1877_s16  ;;  %s215_s20 = sadd.s32 1, %s1413_s29 }
  0x11   : > { %p213_p11 = scmp.eq.s32.totalorder %s212_s19, 0  ;;  %286 = sbr.rel (%p283_p10) target bundleno = 1236 (0x4d4), region = 52 }
  0x12   : > { %s1854_s22 = sand.u32 (!%p283_p10), 1, %s1409_s28   ;;  %p319_p12 = scmp.lt.s32.totalorder (!%p283_p10), %s1421_s9, 1 }
  0x13   : > { %s1553_s21 = scalar_select %p213_p11, %s1413_s29, %s215_s20  }
  0x14   : > { %s1559_s23 = sshll.u32 (!%p283_p10), %s1854_s22, 1  ;;  %p321_p13 = scmp.lt.s32.totalorder (!%p283_p10), %s1417_s30, 1 }
  0x15   : > { %1861 = sst [smem:[#allocation10_spill]] %s1553_s21  ;;  %s318_s15 = scalar_lea.vmem (!%p283_p10), [#allocation3], %s1559_s23 }
  0x16   : > { %p1039_p0 = scmp.ne.s32.totalorder (!%p283_p10), %s1417_s30, 0 }
  0x18   : > { %s320_s24 = scalar_select %p319_p12, %s1421_s9, 1 }
  0x19   : > { %s322_s25 = scalar_select %p321_p13, %s1417_s30, 1 }
  0x1a   : > { %s1037_s26 = sshll.u32 %s320_s24, 1  ;;  %331 = sbr.rel (%p1039_p0) target bundleno = 33 (0x21), region = 56  ;;  %v332_v0 = vld [vmem:[%s1845_s3] sm:$0xff] (!%p1039_p0)  ;;  %v333_v1 = vld [vmem:[%s1845_s3 + $0x8] sm:$0xff] (!%p1039_p0) }
  0x1b   : > { %s324_s13 = sadd.s32 %s1037_s26, %s322_s25  ;;  %334 = vst [vmem:[#allocation2] sm:$0xff] (!%p1039_p0), %v332_v0  ;;  %335 = vst [vmem:[#allocation2 + $0x8] sm:$0xff] (!%p1039_p0), %v333_v1 }
  0x1c   : > { %s1038_s14 = sshll.u32 %s324_s13, 2 }
  0x1d   : > { %s326_s16 = scalar_lea.vmem %s1842_s0, %s1038_s14 }
  0x21 PF: > { %v336_v2 = vld [vmem:[%s326_s16] sm:$0xf]  ;;  %vm537_vm0 = vcmask 1041408   ;;  %v1435_v3 = vmov 0.0   ;;  %vm1436_vm1 = vmmov 0   ;;  %vm509_vm2 = vcmask 31744  }
  0x22   : > { %1110 = vmatprep.subr.bf16.mxu0 %v1435_v3  ;;  %v337_v4 = vpack.c.bf16 %v336_v2, %v336_v2  ;;  %1112 = vmatprep.mubr.msk.bf16.mxu0 %vm1436_vm1, %v1435_v3  ;;  %v1330_v6 = vld [vmem:[%s1843_s1] sm:$0xff]   ;;  %v1437_v7 = vmov 0   ;;  %v358_v8 = vld [vmem:[%s1844_s2 + $0x10] sm:$0xff]  ;;  %v359_v10 = vld [vmem:[%s1844_s2 + $0x18] sm:$0xff]  ;;  %p1058_p1 = scmp.ne.s32.totalorder %s1417_s30, 1 }
  0x23   : > { %1148 = vmatprep.subr.bf16.mxu1 %v1435_v3  ;;  %1164 = vmatprep.mubr.msk.bf16.mxu1 %vm1436_vm1, %v1435_v3  ;;  %v360_v9 = vld [vmem:[%s1844_s2 + $0x20] sm:$0xff]  ;;  %v361_v11 = vld [vmem:[%s1844_s2 + $0x28] sm:$0xff]  ;;  %v362_v13 = vld [vmem:[%s1844_s2 + $0x30] sm:$0xff]  ;;  %vm812_vm3 = vcmask (!%p1058_p1), 130048   ;;  %vm1439_vm4 = vmmov (!%p1058_p1), 0  }
  0x24   : > { %v539_v5 = vsel %vm537_vm0, %v337_v4, 0  ;;  %1328 = vset.pattern.permute.xlu0 %v1437_v7  ;;  %1329 = vset.pattern.permute.xlu1 %v1437_v7  ;;  %v1331_v12 = vld [vmem:[%s1843_s1 + $0x8] sm:$0xff]   ;;  %v363_v14 = vld [vmem:[%s1844_s2 + $0x38] sm:$0xff]  ;;  %v364_v15 = vld [vmem:[%s1844_s2 + $0x40] sm:$0xff] }
  0x25   : > { %1111 = vmatpush3.bf16.msra.mxu0 %v539_v5  ;;  %386 = vperm.xlu0 %1328, %v358_v8   ;;  %v365_v16 = vld [vmem:[%s1844_s2 + $0x48] sm:$0xff]  ;;  %v1332_v17 = vld [vmem:[%s1843_s1 + $0x10] sm:$0xff]   ;;  %v367_v19 = vld [vmem:[%s1844_s2 + $0x58] sm:$0xff] }
  0x26   : > { %396 = vperm.xlu1 %1329, %v360_v9   ;;  %v366_v18 = vld [vmem:[%s1844_s2 + $0x50] sm:$0xff]  ;;  %v368_v20 = vld [vmem:[%s1844_s2 + $0x60] sm:$0xff]  ;;  %v369_v21 = vld [vmem:[%s1844_s2 + $0x68] sm:$0xff] }
  0x27   : > { %v1333_v22 = vld [vmem:[%s1843_s1 + $0x18] sm:$0xff]   ;;  %v370_v23 = vld [vmem:[%s1844_s2 + $0x70] sm:$0xff]  ;;  %v372_v25 = vld [vmem:[%s1844_s2 + $0x80] sm:$0xff] }
  0x28   : > { %1113 = vmatmul.mubr.msk.bf16.vlgmr.msra.gmra.mrb[0].mxu0 %vm509_vm2, %v1330_v6  ;;  %v371_v24 = vld [vmem:[%s1844_s2 + $0x78] sm:$0xff]  ;;  %v373_v26 = vld [vmem:[%s1844_s2 + $0x88] sm:$0xff]  ;;  %v1334_v27 = vld [vmem:[%s1843_s1 + $0x20] sm:$0xff]  }
  0x29   : > { %1116 = vmatprep.mubr.msk.bf16.mxu0 %vm1436_vm1, %v1435_v3  ;;  %391 = vperm.xlu0 %1328, %v359_v10   ;;  %v356_v28 = vld [vmem:[%s1844_s2] sm:$0xff]  ;;  %v357_v29 = vld [vmem:[%s1844_s2 + $0x8] sm:$0xff]  ;;  %v1336_v31 = vld [vmem:[%s1843_s1 + $0x30] sm:$0xff]  }
  0x2a   : > { %401 = vperm.xlu1 %1329, %v361_v11   ;;  %v1335_v30 = vld [vmem:[%s1843_s1 + $0x28] sm:$0xff]   ;;  %v1337_v32 = vld [vmem:[%s1843_s1 + $0x38] sm:$0xff]   ;;  %v1338_v33 = vld [vmem:[%s1843_s1 + $0x40] sm:$0xff]  }
  0x2d   : > { %406 = vperm.xlu0 %1328, %v362_v13  }
  0x2e   : > { %411 = vperm.xlu1 %1329, %v363_v14  }
  0x30   : > { %1117 = vmatmul.mubr.msk.bf16.gmra.mrb[4].mxu0 %vm509_vm2, %v1331_v12 }
  0x31   : > { %1120 = vmatprep.mubr.msk.bf16.mxu0 %vm1436_vm1, %v1435_v3  ;;  %416 = vperm.xlu0 %1328, %v364_v15  }
  0x32   : > { %421 = vperm.xlu1 %1329, %v365_v16  }
  0x35   : > { %426 = vperm.xlu0 %1328, %v366_v18  }
  0x36   : > { %431 = vperm.xlu1 %1329, %v367_v19  }
  0x38   : > { %1121 = vmatmul.mubr.msk.bf16.gmra.mrb[8].mxu0 %vm509_vm2, %v1332_v17 }
  0x39   : > { %1124 = vmatprep.mubr.msk.bf16.mxu0 %vm1436_vm1, %v1435_v3  ;;  %436 = vperm.xlu0 %1328, %v368_v20  }
  0x3a   : > { %441 = vperm.xlu1 %1329, %v369_v21  }
  0x3d   : > { %446 = vperm.xlu0 %1328, %v370_v23  }
  0x3e   : > { %451 = vperm.xlu1 %1329, %v371_v24  }
  0x40   : > { %1125 = vmatmul.mubr.msk.bf16.gmra.mrb[12].mxu0 %vm509_vm2, %v1333_v22 }
  0x41   : > { %1128 = vmatprep.mubr.msk.bf16.mxu0 %vm1436_vm1, %v1435_v3  ;;  %456 = vperm.xlu0 %1328, %v372_v25  }
  0x42   : > { %461 = vperm.xlu1 %1329, %v373_v26  }
  0x45   : > { %376 = vperm.xlu0 %1328, %v356_v28  }
  0x46   : > { %381 = vperm.xlu1 %1329, %v357_v29  }
  0x48   : > { %1129 = vmatmul.mubr.msk.bf16.gmra.mrb[16].mxu0 %vm509_vm2, %v1334_v27 }
  0x49   : > { %1132 = vmatprep.mubr.msk.bf16.mxu0 %vm1436_vm1, %v1435_v3 }
  0x50   : > { %1133 = vmatmul.mubr.msk.bf16.gmra.mrb[20].mxu0 %vm509_vm2, %v1335_v30 }
  0x51   : > { %1136 = vmatprep.mubr.msk.bf16.mxu0 %vm1436_vm1, %v1435_v3 }
  0x58   : > { %1137 = vmatmul.mubr.msk.bf16.gmra.mrb[24].mxu0 %vm509_vm2, %v1336_v31 }
  0x59   : > { %1140 = vmatprep.mubr.msk.bf16.mxu0 %vm1436_vm1, %v1435_v3 }
  0x60   : > { %1141 = vmatmul.mubr.msk.bf16.gmra.mrb[28].mxu0 %vm509_vm2, %v1337_v32 }
  0x61   : > { %1144 = vmatprep.mubr.msk.bf16.mxu0 %vm1436_vm1, %v1435_v3 }
  0x68   : > { %1145 = vmatmul.mubr.msk.bf16.gmra.mrb[32].mxu0 %vm509_vm2, %v1338_v33 }
  0xa4   : > { %v387_v34 = vpop.permute.xlu0 %386 }
  0xa5   : > { %v397_v35 = vpop.permute.xlu1 %396 }
  0xa8   : > { %v392_v36 = vpop.permute.xlu0 %391 }
  0xa9   : > { %v402_v37 = vpop.permute.xlu1 %401 }
  0xac   : > { %v407_v38 = vpop.permute.xlu0 %406 }
  0xad   : > { %v412_v39 = vpop.permute.xlu1 %411 }
  0xb0   : > { %v417_v40 = vpop.permute.xlu0 %416 }
  0xb1   : > { %v422_v41 = vpop.permute.xlu1 %421 }
  0xb4   : > { %v427_v42 = vpop.permute.xlu0 %426 }
  0xb5   : > { %v432_v43 = vpop.permute.xlu1 %431 }
  0xb8   : > { %v1687_v44 = vpop.permute.xlu0 %436 }
  0xb9   : > { %v1689_v45 = vpop.permute.xlu1 %441 }
  0xbc   : > { %v1691_v46 = vpop.permute.xlu0 %446 }
  0xbd   : > { %v1693_v47 = vpop.permute.xlu1 %451 }
  0xc0   : > { %v1695_v48 = vpop.permute.xlu0 %456 }
  0xc1   : > { %v1697_v49 = vpop.permute.xlu1 %461 }
  0xc4   : > { %v377_v50 = vpop.permute.xlu0 %376 }
  0xc5   : > { %v382_v52 = vpop.permute.xlu1 %381 }
  0xfb   : > { %v575_v51 = vpop.f32.mrb[0].mxu0 }
  0xfc   : > { %v1114_v53 = vpop.f32.mrb[1].mxu0  ;;  %v1699_v55 = vadd.f32 %v575_v51, %v377_v50 }
  0xfd   : > { %v578_v54 = vpop.f32.mrb[2].mxu0 }
  0xfe   : > { %v1701_v56 = vadd.f32 %v578_v54, %v382_v52  ;;  %v1115_v57 = vpop.f32.mrb[3].mxu0 }
 0x100   : > { %v646_v58 = vpack.c.bf16 %v1701_v56, %v1699_v55  ;;  %v710_v55 = vld [vmem:[%s1846_s4 + $0x10] sm:$0xff] (!%p1058_p1) }
 0x103   : > { %v583_v59 = vpop.f32.mrb[4].mxu0 }
 0x104   : > { %v1118_v60 = vpop.f32.mrb[5].mxu0  ;;  %v584_v62 = vadd.f32 %v583_v59, %v387_v34  ;;  %v656_v59 = vld [vmem:[#allocation2 + $0x8] sm:$0xff] }
 0x105   : > { %v586_v61 = vpop.f32.mrb[6].mxu0 }
 0x106   : > { %v587_v63 = vadd.f32 %v586_v61, %v392_v36  ;;  %v1119_v0 = vpop.f32.mrb[7].mxu0 }
 0x108   : > { %v647_v1 = vpack.c.bf16 %v587_v63, %v584_v62 }
 0x10a   : > { %1149 = vmatpush3.bf16.xpose.msra.mxu1 %v647_v1  ;;  %v712_v1 = vld [vmem:[%s1846_s4 + $0x20] sm:$0xff] (!%p1058_p1) }
 0x10b   : > { %v591_v2 = vpop.f32.mrb[8].mxu0  ;;  %1150 = vmatprep.subr.bf16.mxu1 %v1435_v3 }
 0x10c   : > { %v1122_v4 = vpop.f32.mrb[9].mxu0  ;;  %v592_v6 = vadd.f32 %v591_v2, %v397_v35  ;;  %v713_v2 = vld [vmem:[%s1846_s4 + $0x28] sm:$0xff] (!%p1058_p1) }
 0x10d   : > { %v594_v5 = vpop.f32.mrb[10].mxu0  ;;  %v1224_v4 = vpack.c.bf16 (!%p1058_p1), %v713_v2, %v712_v1 }
 0x10e   : > { %v595_v7 = vadd.f32 %v594_v5, %v402_v37  ;;  %v1123_v8 = vpop.f32.mrb[11].mxu0 }
 0x110   : > { %v648_v9 = vpack.c.bf16 %v595_v7, %v592_v6  ;;  %v714_v6 = vld [vmem:[%s1846_s4 + $0x30] sm:$0xff] (!%p1058_p1)  ;;  %v715_v7 = vld [vmem:[%s1846_s4 + $0x38] sm:$0xff] (!%p1058_p1) }
 0x111   : > { %v1228_v8 = vpack.c.bf16 (!%p1058_p1), %v715_v7, %v714_v6 }
 0x112   : > { %1151 = vmatpush3.bf16.xpose.msra.mxu1 %v648_v9  ;;  %v716_v9 = vld [vmem:[%s1846_s4 + $0x40] sm:$0xff] (!%p1058_p1) }
 0x113   : > { %v599_v10 = vpop.f32.mrb[12].mxu0  ;;  %1152 = vmatprep.subr.bf16.mxu1 %v1435_v3 }
 0x114   : > { %v1126_v11 = vpop.f32.mrb[13].mxu0  ;;  %v600_v13 = vadd.f32 %v599_v10, %v407_v38  ;;  %v717_v10 = vld [vmem:[%s1846_s4 + $0x48] sm:$0xff] (!%p1058_p1) }
 0x115   : > { %v602_v12 = vpop.f32.mrb[14].mxu0  ;;  %v1232_v11 = vpack.c.bf16 (!%p1058_p1), %v717_v10, %v716_v9 }
 0x116   : > { %v603_v14 = vadd.f32 %v602_v12, %v412_v39  ;;  %v1127_v15 = vpop.f32.mrb[15].mxu0  ;;  %v718_v12 = vld [vmem:[%s1846_s4 + $0x50] sm:$0xff] (!%p1058_p1) }
 0x117   : > { %v720_v15 = vld [vmem:[%s1846_s4 + $0x60] sm:$0xff] (!%p1058_p1) }
 0x118   : > { %v649_v16 = vpack.c.bf16 %v603_v14, %v600_v13  ;;  %v719_v13 = vld [vmem:[%s1846_s4 + $0x58] sm:$0xff] (!%p1058_p1) }
 0x119   : > { %v1236_v14 = vpack.c.bf16 (!%p1058_p1), %v719_v13, %v718_v12 }
 0x11a   : > { %1153 = vmatpush3.bf16.xpose.msra.mxu1 %v649_v16  ;;  %v721_v16 = vld [vmem:[%s1846_s4 + $0x68] sm:$0xff] (!%p1058_p1) }
 0x11b   : > { %v607_v17 = vpop.f32.mrb[16].mxu0  ;;  %1154 = vmatprep.subr.bf16.mxu1 %v1435_v3 }
 0x11c   : > { %v1130_v18 = vpop.f32.mrb[17].mxu0  ;;  %v608_v20 = vadd.f32 %v607_v17, %v417_v40  ;;  %v1240_v17 = vpack.c.bf16 (!%p1058_p1), %v721_v16, %v720_v15 }
 0x11d   : > { %v610_v19 = vpop.f32.mrb[18].mxu0  ;;  %v722_v18 = vld [vmem:[%s1846_s4 + $0x70] sm:$0xff] (!%p1058_p1) }
 0x11e   : > { %v611_v21 = vadd.f32 %v610_v19, %v422_v41  ;;  %v1131_v22 = vpop.f32.mrb[19].mxu0  ;;  %v723_v19 = vld [vmem:[%s1846_s4 + $0x78] sm:$0xff] (!%p1058_p1) }
 0x11f   : > { %v810_v22 = vld [vmem:[%s1848_s6] sm:$0xff] (!%p1058_p1) }
 0x120   : > { %v650_v23 = vpack.c.bf16 %v611_v21, %v608_v20  ;;  %v1244_v20 = vpack.c.bf16 (!%p1058_p1), %v723_v19, %v722_v18 }
 0x122   : > { %1155 = vmatpush3.bf16.xpose.msra.mxu1 %v650_v23  ;;  %v1059_v23 = vld [vmem:[%s1847_s5] ss:$0 sm:$0xff] (!%p1058_p1) }
 0x123   : > { %v615_v24 = vpop.f32.mrb[20].mxu0  ;;  %1156 = vmatprep.subr.bf16.mxu1 %v1435_v3 }
 0x124   : > { %v1134_v25 = vpop.f32.mrb[21].mxu0  ;;  %v616_v27 = vadd.f32 %v615_v24, %v427_v42 }
 0x125   : > { %v618_v26 = vpop.f32.mrb[22].mxu0 }
 0x126   : > { %v619_v28 = vadd.f32 %v618_v26, %v432_v43  ;;  %v1135_v29 = vpop.f32.mrb[23].mxu0 }
 0x128   : > { %v651_v30 = vpack.c.bf16 %v619_v28, %v616_v27 }
 0x12a   : > { %1157 = vmatpush3.bf16.xpose.msra.mxu1 %v651_v30 }
 0x12b   : > { %v623_v31 = vpop.f32.mrb[24].mxu0  ;;  %1158 = vmatprep.subr.bf16.mxu1 %v1435_v3 }
 0x12c   : > { %v1138_v32 = vpop.f32.mrb[25].mxu0  ;;  %v624_v34 = vadd.f32 %v623_v31, %v1687_v44 }
 0x12d   : > { %v626_v33 = vpop.f32.mrb[26].mxu0 }
 0x12e   : > { %v627_v35 = vadd.f32 %v626_v33, %v1689_v45  ;;  %v1139_v36 = vpop.f32.mrb[27].mxu0  ;;  %v811_v33 = vld [vmem:[%s1848_s6 + $0x8] sm:$0xff] (!%p1058_p1) }
 0x130   : > { %v652_v37 = vpack.c.bf16 %v627_v35, %v624_v34  ;;  %v1438_v34 = vmov (!%p1058_p1), 0.0  }
 0x132   : > { %1159 = vmatpush3.bf16.xpose.msra.mxu1 %v652_v37 }
 0x133   : > { %v631_v38 = vpop.f32.mrb[28].mxu0  ;;  %1160 = vmatprep.subr.bf16.mxu1 %v1435_v3 }
 0x134   : > { %v1142_v39 = vpop.f32.mrb[29].mxu0  ;;  %v632_v41 = vadd.f32 %v631_v38, %v1691_v46  ;;  %v655_v46 = vld [vmem:[#allocation2] sm:$0xff] }
 0x135   : > { %v634_v40 = vpop.f32.mrb[30].mxu0  ;;  %v894_v38 = vld [vmem:[%s1849_s7] sm:$0x3] (!%p1058_p1) }
 0x136   : > { %v635_v42 = vadd.f32 %v634_v40, %v1693_v47  ;;  %v1143_v43 = vpop.f32.mrb[31].mxu0 }
 0x138   : > { %v653_v50 = vpack.c.bf16 %v635_v42, %v632_v41 }
 0x13a   : > { %1161 = vmatpush3.bf16.xpose.msra.mxu1 %v653_v50 }
 0x13b   : > { %v639_v51 = vpop.f32.mrb[32].mxu0  ;;  %1162 = vmatprep.subr.bf16.mxu1 %v1435_v3 }
 0x13c   : > { %v1146_v44 = vpop.f32.mrb[33].mxu0  ;;  %v640_v52 = vadd.f32 %v639_v51, %v1695_v48  ;;  %v708_v48 = vld [vmem:[%s1846_s4] sm:$0xff] (!%p1058_p1) }
 0x13d   : > { %v642_v45 = vpop.f32.mrb[34].mxu0 }
 0x13e   : > { %v643_v53 = vadd.f32 %v642_v45, %v1697_v49  ;;  %v1147_v54 = vpop.f32.mrb[35].mxu0  ;;  %v709_v49 = vld [vmem:[%s1846_s4 + $0x8] sm:$0xff] (!%p1058_p1) }
 0x13f   : > { %v1216_v56 = vpack.c.bf16 (!%p1058_p1), %v709_v49, %v708_v48 }
 0x140   : > { %v654_v57 = vpack.c.bf16 %v643_v53, %v640_v52 }
 0x141   : > { %1217 = vmatprep.subr.bf16.mxu0 (!%p1058_p1), %v1216_v56 }
 0x142   : > { %1163 = vmatpush3.bf16.xpose.msra.mxu1 %v654_v57  ;;  %1219 = vmatpush3.bf16.msra.mxu0 (!%p1058_p1), %v1216_v56 }
 0x149   : > { %1165 = vmatmul.mubr.bf16.vlgmr.msra.gmra.mrb[0].mxu1 %v646_v58  ;;  %v711_v58 = vld [vmem:[%s1846_s4 + $0x18] sm:$0xff] (!%p1058_p1) }
 0x14a   : > { %v1220_v0 = vpack.c.bf16 (!%p1058_p1), %v711_v58, %v710_v55  ;;  %1207 = vmatprep.mubr.msk.f32.mxu1 (!%p1058_p1), %vm812_vm3, %v810_v22 }
 0x14c   : > { %1221 = vmatprep.subr.bf16.mxu0 (!%p1058_p1), %v1220_v0 }
 0x14d   : > { %1223 = vmatpush3.bf16.msra.mxu0 (!%p1058_p1), %v1220_v0 }
 0x14e   : > { %1225 = vmatprep.subr.bf16.mxu0 (!%p1058_p1), %v1224_v4 }
 0x151   : > { %1227 = vmatpush3.bf16.msra.mxu0 (!%p1058_p1), %v1224_v4 }
 0x152   : > { %1229 = vmatprep.subr.bf16.mxu0 (!%p1058_p1), %v1228_v8 }
 0x155   : > { %1231 = vmatpush3.bf16.msra.mxu0 (!%p1058_p1), %v1228_v8 }
 0x156   : > { %1233 = vmatprep.subr.bf16.mxu0 (!%p1058_p1), %v1232_v11 }
 0x159   : > { %1235 = vmatpush3.bf16.msra.mxu0 (!%p1058_p1), %v1232_v11 }
 0x15a   : > { %1237 = vmatprep.subr.bf16.mxu0 (!%p1058_p1), %v1236_v14 }
 0x15d   : > { %1239 = vmatpush3.bf16.msra.mxu0 (!%p1058_p1), %v1236_v14 }
 0x15e   : > { %1241 = vmatprep.subr.bf16.mxu0 (!%p1058_p1), %v1240_v17 }
 0x161   : > { %1243 = vmatpush3.bf16.msra.mxu0 (!%p1058_p1), %v1240_v17 }
 0x162   : > { %1245 = vmatprep.subr.bf16.mxu0 (!%p1058_p1), %v1244_v20 }
 0x165   : > { %1247 = vmatpush3.bf16.msra.mxu0 (!%p1058_p1), %v1244_v20 }
 0x21b   : > { %705 = sbr.rel (%p1058_p1) target bundleno = 1211 (0x4bb), region = 60 }
 0x21c   : > { %v691_v47 = vpop.f32.mrb[0].mxu1 }
 0x21d   : > { %v698_v60 = vadd.f32 %v691_v47, %v655_v46  ;;  %v1166_v61 = vpop.f32.mrb[1].mxu1 }
 0x21e   : > { %v694_v62 = vpop.f32.mrb[2].mxu1 }
 0x21f   : > { %700 = vst [vmem:[#allocation2] sm:$0xff] %v698_v60  ;;  %v699_v3 = vadd.f32 %v694_v62, %v656_v59  ;;  %v1167_v63 = vpop.f32.mrb[3].mxu1 }
 0x221   : > { %701 = vst [vmem:[#allocation2 + $0x8] sm:$0xff] %v699_v3 }
 0x226   : > { %v706_v5 = vld [vmem:[#allocation2] sm:$0xff] }
 0x227   : > { %1200 = vmatprep.mubr.f32.mxu0 %v706_v5 }
 0x228   : > { %v707_v21 = vld [vmem:[#allocation2 + $0x8] sm:$0xff] }
 0x229   : > { %1201 = vmatmul.mubr.f32.vlgmr.msra.gmra.mrb[0].mxu0 %v707_v21 }
 0x2fc   : > { %v1202_v24 = vpop.f32.mrb[0].mxu0 }
 0x2fd   : > { %v803_v25 = vadd.f32 %v1202_v24, %v1059_v23  ;;  %v797_v26 = vpop.f32.mrb[1].mxu0 }
 0x2fe   : > { %v798_v27 = vadd.f32 %v1059_v23, %v797_v26 }
 0x2ff   : > { %v807_v28 = vadd.f32 %v803_v25, %v707_v21 }
 0x300   : > { %v806_v29 = vadd.f32 %v798_v27, %v706_v5 }
 0x301   : > { %v809_v30 = vmax.f32 %v807_v28, 0.0 }
 0x302   : > { %v808_v31 = vmax.f32 %v806_v29, 0.0 }
 0x304   : > { %v1248_v32 = vpack.c.bf16 %v809_v30, %v808_v31 }
 0x306   : > { %1249 = vmatprep.subr.bf16.mxu1 %v1248_v32 }
 0x307   : > { %1251 = vmatpush3.bf16.msra.mxu1 %v1248_v32 }
 0x308   : > { %1210 = vmatprep.subr.bf16.mxu1 %v1438_v34 }
 0x30a   : > { %1208 = vmatmul.mubr.msk.f32.vlgmr.msra.gmra.mrb[0].mxu1 %vm812_vm3, %v811_v33 }
 0x30b   : > { %1212 = vmatprep.mubr.msk.bf16.mxu1 %vm1439_vm4, %v1438_v34 }
 0x3dd   : > { %v1209_v35 = vpop.f32.mrb[0].mxu1 }
 0x3de   : > { %v885_v36 = vpop.f32.mrb[1].mxu1 }
 0x3df   : > { %v895_v37 = vpack.c.bf16 %v1209_v35, %v885_v36 }
 0x3e1   : > { %1211 = vmatpush3.bf16.msra.mxu1 %v895_v37 }
 0x3e4   : > { %1213 = vmatmul.mubr.msk.bf16.vlgmr.msra.gmra.mrb[4].mxu1 %vm812_vm3, %v894_v38 }
 0x4b7   : > { %v933_v39 = vpop.f32.mrb[4].mxu1 }
 0x4b8   : > { %v939_v40 = vpack.c.bf16 %v933_v39, %v933_v39  ;;  %v1214_v41 = vpop.f32.mrb[5].mxu1 }
 0x4b9   : > { %v936_v42 = vpop.f32.mrb[6].mxu1 }
 0x4ba   : > { %940 = vst [vmem:[%s318_s15] sm:$0x3] %v939_v40  ;;  %v1215_v43 = vpop.f32.mrb[7].mxu1 }
 0x4bb PF: > { %s1064_s26 = sshll.u32 %s1421_s9, 5  ;;  %s955_s20 = sshll.u32 %s318_s15, 4  ;;  %s956_s20 = int_to_ptr.vmem [resolvable:$true] %s955_s20 }
 0x4bc   : > { %s1791_s19 = scalar_lea.hbm %s1850_s8, %s1064_s26  ;;  %s1862_s10 = sand.u32 1, %s1409_s28  }
 0x4bd   : > { %s942_s11 = scalar_lea.sflag [#allocation4], %s1862_s10  ;;  %s1339_s30 = scalar_lea.vmem %s956_s20, 32 }
 0x4be   : > { %p1340_p2 = scmp.ne.s32.totalorder %s956_s20, %s1339_s30  ;;  %s1440_s16 = smov [#allocation3]  }
 0x4bf   : > { %s1343_s21 = sshll.u32 %s1440_s16, 4  ;;  %s1344_s21 = int_to_ptr.vmem [resolvable:$false] %s1343_s21 }
 0x4c0   : > { %p1341_p4 = pnand %p1340_p2, %p1535_p3  ;;  %s1345_s22 = scalar_lea.vmem %s1344_s21, 64 }
 0x4c1   : > { %p1346_p6 = scmp.lt.s32.totalorder %s956_s20, %s1344_s21  ;;  %p1347_p7 = scmp.lt.s32.totalorder %s1345_s22, %s1339_s30 }
 0x4c2   : > { %p1342_p5 = pneg %p1341_p4 }
 0x4c3   : > { %p1348_p8 = por %p1347_p7, %p1346_p6 }
 0x4c5   : > { %p1349_p10 = pnand %p1348_p8, %p1342_p5 }
 0x4c7   : > { %1352 = shalt.err (!%p1349_p10)
}
 0x4c8   : > { %s1353_s9 = scalar_lea.hbm %s1791_s19, 32  ;;  %s1357_s24 = scalar_lea.hbm %s1850_s8, 64 }
 0x4c9   : > { %p1354_p11 = scmp.ne.s32.totalorder %s1791_s19, %s1353_s9  ;;  %p1358_p0 = scmp.lt.u32.totalorder %s1791_s19, %s1850_s8 }
 0x4ca   : > { %p1359_p1 = scmp.lt.u32.totalorder %s1357_s24, %s1353_s9  ;;  %p1361_p4 = scmp.lt.u32.totalorder %s1353_s9, %s1791_s19 }
 0x4cb   : > { %p1355_p12 = pnand %p1354_p11, %p1535_p3 }
 0x4cc   : > { %p1360_p2 = por %p1359_p1, %p1358_p0 }
 0x4cd   : > { %p1356_p13 = pneg %p1355_p12 }
 0x4ce   : > { %p1362_p5 = por %p1361_p4, %p1360_p2 }
 0x4d0   : > { %p1363_p6 = pnand %p1362_p5, %p1356_p13 }
 0x4d2   : > { %1366 = shalt.err (!%p1363_p6)
}
 0x4d3   : > { %1252 = dma.vmem_to_hbm [thread:$0]  (%p1535_p3), %s956_s20, 32, %s1791_s19, %s942_s11  }
 0x4d4 PF: > { %p1258_p7 = scmp.ge.s32.totalorder %s1433_s12, 2  ;;  %s967_s13 = sand.u32 1, %s1405_s27  }
 0x4d5   : > { %s968_s14 = scalar_lea.sflag [#allocation4], %s967_s13 }
 0x4d6   : > { %p1255_p8 = pnand %p1258_p7, %p1545_p9 }
 0x4d8   : > { %1400 = dma.done.wait (!%p1255_p8), %s968_s14, 32  }
 0x4d9   : > { %1402 = vsyncadd (!%p1255_p8), %s968_s14, 4294967264  ;;  %s21_s12 = sadd.s32 1, %s1433_s12   ;;  %s1863_s10 = sld [smem:[#allocation10_spill]] }
 0x4da   : > { %p18_p10 = scmp.ge.s32.totalorder %s21_s12, 6   ;;  %s1864_s30 = sld [smem:[#allocation6_spill]] }
 0x4db   : > { %s1865_s9 = sld [smem:[#allocation7_spill]]  ;;  %s1866_s17 = sld [smem:[#allocation8_spill]] }
 0x4dc   : > { %s1867_s11 = sld [smem:[#allocation9_spill]]  ;;  %s1868_s27 = smov %s1409_s28 }
 0x4dd   : > { %s1869_s28 = smov %s1413_s29  ;;  %20 = sbr.rel (!%p18_p10) target bundleno = 5 (0x5), region = 95 }
 0x4df   : > { %s1870_s29 = smov %s1863_s10 }
 0x4e1   : > { %s1871_s10 = smov %s1866_s17 }
 0x4e4   :  { %973 = vsyncpa [#allocation4], 1 }
 0x4e5   :  { %975 = vsyncpa [#allocation4 + $0x1], 1 }

</bundles_post_ra>
